<compile_context>
chip_gen: v6e
topology: v6e:2x2x1
jax: 0.10.0
libtpu: 0.0.40
codegen_flags: <defaults>
</compile_context>

<pallas_src>
import math
from functools import partial

import jax
import jax.numpy as jnp
from jax import lax
from jax.experimental import pallas as pl
from jax.experimental.pallas import tpu as pltpu


def _pos_enc_kernel(seed_ref, x_ref, pe_ref, o_ref, *, batch, dropout_p, training):
    ts, cols = x_ref.shape            # static block shape: (TS, B*E)
    x = x_ref[...]                    # compute in the input dtype (no f32 upcast)
    pe = pe_ref[...]                  # (TS, E), already cast to x.dtype in wrapper

    # Broadcast the positional table over the batch axis: in the (S, B*E) layout
    # x2d[s, b*E + e] = x[s, b, e], so pe must repeat B times along the lane dim.
    if batch > 1:
        pe = jnp.tile(pe, (1, batch))         # (TS, B*E)
    y = x + pe

    if training and dropout_p > 0.0:
        keep_prob = 1.0 - float(dropout_p)
        scale = 1.0 / keep_prob                                   # hoisted Python const
        thresh = jnp.int32(min(int(keep_prob * 2147483648.0), 2147483647))

        # Tiling-invariant per-element randomness: hash(global flat index ^ seed).
        row0 = pl.program_id(0) * ts
        r = lax.broadcasted_iota(jnp.int32, (ts, cols), 0) + row0
        c = lax.broadcasted_iota(jnp.int32, (ts, cols), 1)
        h = (r * cols + c) ^ seed_ref[0]
        # 32-bit avalanche hash (xor-shift-multiply); all plain int32 VPU ops.
        h = (h ^ lax.shift_right_logical(h, jnp.int32(16))) * jnp.int32(0x45D9F3B)
        h = (h ^ lax.shift_right_logical(h, jnp.int32(16))) * jnp.int32(0x45D9F3B)
        h = h ^ lax.shift_right_logical(h, jnp.int32(16))
        bits = jnp.bitwise_and(h, jnp.int32(0x7FFFFFFF))          # uniform in [0, 2^31)
        keep = bits < thresh                                       # integer-threshold compare
        y = jnp.where(keep, y * scale, jnp.zeros_like(y))          # fused scale + mask

    o_ref[...] = y.astype(o_ref.dtype)


def make_pos_embedding(emb_size: int, maxlen: int = 5000, dtype=jnp.float32):
    """Same sin/cos table as the PyTorch __init__ (the unsqueeze(-2) broadcast over
    the batch axis is handled inside the kernel instead)."""
    assert emb_size % 2 == 0, "emb_size must be even (as the PyTorch module assumes)"
    den = jnp.exp(-jnp.arange(0, emb_size, 2, dtype=jnp.float32)
                  * (math.log(10000.0) / emb_size))
    pos = jnp.arange(0, maxlen, dtype=jnp.float32)[:, None]
    pe = jnp.zeros((maxlen, emb_size), dtype=jnp.float32)
    pe = pe.at[:, 0::2].set(jnp.sin(pos * den))
    pe = pe.at[:, 1::2].set(jnp.cos(pos * den))
    return pe.astype(dtype)                   # (maxlen, emb_size)


def positional_encoding(x, pos_embedding, *, dropout_p=0.1, training=False, seed=0):
    """x: (S, B, E) token embeddings; pos_embedding: (maxlen, E) table."""
    S, B, E = x.shape
    C = B * E
    dtype = x.dtype
    itemsize = jnp.dtype(dtype).itemsize

    pe = pos_embedding[:S].astype(dtype)      # (S, E); bf16 table if x is bf16
    x2d = x.reshape(S, C)                     # lane-dense 2-D view of (S, B, E)

    # ~1 MiB blocks along the sequence axis (multiple of 8 rows) so the BlockSpec
    # pipeline double-buffers input/output DMAs.  Working set is
    # 2*(x_blk + out_blk) + 2*pe_blk ~ 5 MiB, well inside the 32 MiB scoped-VMEM
    # limit requested below on every generation (v5e/v6e 128 MiB, v7x 64 MiB phys).
    rows_per_block = max(1, (1 << 20) // (C * itemsize))
    TS = max(8, (rows_per_block // 8) * 8)
    TS = min(TS, ((S + 7) // 8) * 8)          # don't over-pad short sequences
    num_blocks = (S + TS - 1) // TS
    S_pad = num_blocks * TS

    if S_pad != S:                            # ragged tail: pad rows, slice them off after
        x2d = jnp.pad(x2d, ((0, S_pad - S), (0, 0)))
        pe = jnp.pad(pe, ((0, S_pad - S), (0, 0)))

    kernel = partial(_pos_enc_kernel, batch=B,
                     dropout_p=float(dropout_p), training=bool(training))
    seed_arr = jnp.array([seed], dtype=jnp.int32)

    out2d = pl.pallas_call(
        kernel,
        out_shape=jax.ShapeDtypeStruct((S_pad, C), dtype),
        grid_spec=pltpu.PrefetchScalarGridSpec(
            num_scalar_prefetch=1,                            # dropout seed lives in SMEM
            grid=(num_blocks,),
            in_specs=[
                pl.BlockSpec((TS, C), lambda i, seed_ref: (i, 0)),
                pl.BlockSpec((TS, E), lambda i, seed_ref: (i, 0)),
            ],
            out_specs=pl.BlockSpec((TS, C), lambda i, seed_ref: (i, 0)),
        ),
        compiler_params=pltpu.CompilerParams(
            dimension_semantics=("parallel",),                # independent tiles -> megacore
            vmem_limit_bytes=32 * 1024 * 1024),
    )(seed_arr, x2d, pe)

    return out2d[:S].reshape(S, B, E)


if __name__ == "__main__":
    # Module hyper-params (deterministic, in-script).
    emb_size = 32
    maxlen = 64
    dropout_p = 0.1

    # Example input: (seq_len, batch, emb_size) per the module's axis convention.
    S, B = 8, 2
    key = jax.random.PRNGKey(0)
    x = jax.random.normal(key, (S, B, emb_size), dtype=jnp.float32)
    pos_embedding = make_pos_embedding(emb_size, maxlen)

    # Eval mode (dropout = identity): exact check against a pure-JAX reference.
    out_eval = positional_encoding(x, pos_embedding, dropout_p=dropout_p,
                                   training=False)
    out_eval = jax.block_until_ready(out_eval)
    ref = x + pos_embedding[:S][:, None, :]
    assert out_eval.shape == x.shape and out_eval.dtype == x.dtype
    assert jnp.allclose(out_eval, ref, atol=1e-6, rtol=1e-6), "eval-mode mismatch"

    # Training mode: in-kernel deterministic dropout.  Every element must be either
    # 0 (dropped) or the eval value scaled by 1/(1-p) (kept).
    # TODO(synk): torch.nn.Dropout's exact RNG stream cannot be reproduced; a
    # counter-based hash with a fixed seed is used instead (tiling-invariant).
    out_train = positional_encoding(x, pos_embedding, dropout_p=dropout_p,
                                    training=True, seed=1234)
    out_train = jax.block_until_ready(out_train)
    assert out_train.shape == x.shape and out_train.dtype == x.dtype
    scale = 1.0 / (1.0 - dropout_p)
    ok = jnp.isclose(out_train, 0.0, atol=1e-6) | jnp.isclose(
        out_train, out_eval * scale, atol=1e-4, rtol=1e-4)
    assert bool(jnp.all(ok)), "training-mode dropout mismatch"

    print("KERNEL_OK")
</pallas_src>

<mosaic_0001>
module attributes {stable_mosaic.version = 11 : i64} {
  func.func @_pos_enc_kernel(%arg0: i32, %arg1: memref<1xi32, #tpu.memory_space<smem>>, %arg2: memref<8x64xf32, #tpu.memory_space<vmem>>, %arg3: memref<8x32xf32, #tpu.memory_space<vmem>>, %arg4: memref<8x64xf32, #tpu.memory_space<vmem>>) attributes {dimension_semantics = [#tpu.dimension_semantics<parallel>], iteration_bounds = array<i64: 1>, scalar_prefetch = 1 : i64, scratch_operands = 0 : i64, tpu.core_type = #tpu.core_type<tc>, window_params = [{transform_indices = @transform_0, window_bounds = array<i64: 8, 64>}, {transform_indices = @transform_1, window_bounds = array<i64: 8, 32>}, {transform_indices = @transform_2, window_bounds = array<i64: 8, 64>}]} {
    %c0 = arith.constant 0 : index
    %c0_0 = arith.constant 0 : index
    %0 = vector.load %arg2[%c0, %c0_0] : memref<8x64xf32, #tpu.memory_space<vmem>>, vector<8x64xf32>
    %c0_1 = arith.constant 0 : index
    %c0_2 = arith.constant 0 : index
    %1 = vector.load %arg3[%c0_1, %c0_2] : memref<8x32xf32, #tpu.memory_space<vmem>>, vector<8x32xf32>
    %2 = tpu.concatenate %1, %1 in 1 : vector<8x32xf32>, vector<8x32xf32> -> vector<8x64xf32>
    %3 = arith.addf %0, %2 : vector<8x64xf32>
    %c0_3 = arith.constant 0 : index
    %c0_4 = arith.constant 0 : index
    %4 = vector.load %arg4[%c0_3, %c0_4] : memref<8x64xf32, #tpu.memory_space<vmem>>, vector<8x64xf32>
    tpu.vector_store %arg4[%c0_3, %c0_4], %3 {strides = array<i32>} : memref<8x64xf32, #tpu.memory_space<vmem>>, vector<8x64xf32>,
    return
  }
  func.func @transform_0(%arg0: i32, %arg1: memref<1xi32, #tpu.memory_space<smem>>) -> (i32, i32) {
    %c0_i32 = arith.constant 0 : i32
    %c0_i32_0 = arith.constant 0 : i32
    return %arg0, %c0_i32 : i32, i32
  }
  func.func @transform_1(%arg0: i32, %arg1: memref<1xi32, #tpu.memory_space<smem>>) -> (i32, i32) {
    %c0_i32 = arith.constant 0 : i32
    %c0_i32_0 = arith.constant 0 : i32
    return %arg0, %c0_i32 : i32, i32
  }
  func.func @transform_2(%arg0: i32, %arg1: memref<1xi32, #tpu.memory_space<smem>>) -> (i32, i32) {
    %c0_i32 = arith.constant 0 : i32
    %c0_i32_0 = arith.constant 0 : i32
    return %arg0, %c0_i32 : i32, i32
  }
}

</mosaic_0001>

<bundles_post_ra>
// kernel: tpu_custom_call.1
= control target key start
LH: loop header
LB: loop body
LE: loop exit
PB: predicated region body
PF: predicated region fallthrough
CT: control target
= control target key end

     0   :  { %9 = vsyncpa [#allocation5], 0  ;;  %s168_s0 = inlined_call_operand.<no memory space> [shape: s32[1], index: 0, kind: input, shape index: {}]   ;;  %s169_s1 = inlined_call_operand.hbm [shape: f32[8,64], index: 1, kind: input, shape index: {}]   ;;  %s170_s2 = inlined_call_operand.hbm [shape: f32[8,32], index: 2, kind: input, shape index: {}]   ;;  %s171_s3 = inlined_call_operand.hbm [shape: f32[8,64], index: 3, kind: output, shape index: {}]  }
   0x1   :  { %10 = vsyncpa [#allocation8], 0 }
   0x2   :  { %11 = vsyncpa [#allocation6], 0  ;;  %s135_s12 = smov [#allocation4]   ;;  %s136_s14 = smov [#allocation7]  }
   0x3   :  { %s18_s13 = sshll.u32 %s135_s12, 4  ;;  %s28_s15 = sshll.u32 %s136_s14, 4  ;;  %s19_s13 = int_to_ptr.vmem [resolvable:$true] %s18_s13  ;;  %s29_s15 = int_to_ptr.vmem [resolvable:$true] %s28_s15 }
   0x4   :  { %s77_s16 = scalar_lea.vmem %s19_s13, 128  ;;  %p82_p1 = scmp.lt.s32.totalorder %s19_s13, %s19_s13 }
   0x5   :  { %p78_p0 = scmp.ne.s32.totalorder %s19_s13, %s77_s16  ;;  %p83_p2 = scmp.lt.s32.totalorder %s77_s16, %s77_s16 }
   0x7   :  { %p84_p3 = por %p83_p2, %p82_p1 }
   0x9   :  { %p85_p4 = pnand %p84_p3, %p78_p0 }
   0xb   :  { %88 = shalt.err (!%p85_p4)
}
   0xc   :  { %21 = dma.hbm_to_vmem [thread:$0]  %s169_s1, 128, %s19_s13, [#allocation5]  }
   0xd   :  { %s97_s18 = scalar_lea.vmem %s29_s15, 128  ;;  %p102_p6 = scmp.lt.s32.totalorder %s29_s15, %s29_s15 }
   0xe   :  { %p98_p5 = scmp.ne.s32.totalorder %s29_s15, %s97_s18  ;;  %p103_p7 = scmp.lt.s32.totalorder %s97_s18, %s97_s18 }
  0x10   :  { %p104_p8 = por %p103_p7, %p102_p6 }
  0x12   :  { %p105_p9 = pnand %p104_p8, %p98_p5 }
  0x14   :  { %108 = shalt.err (!%p105_p9)
}
  0x15   :  { %31 = dma.hbm_to_vmem [thread:$0]  %s170_s2, 128, %s29_s15, [#allocation8]  }
  0x16   :  { %129 = dma.done.wait [#allocation5], 128  }
  0x17   :  { %130 = vsyncadd [#allocation5], 4294967168 }
  0x18   :  { %131 = dma.done.wait [#allocation8], 128  }
  0x19   :  { %132 = vsyncadd [#allocation8], 4294967168  ;;  %v39_v0 = vld [vmem:[#allocation7] sm:$0xff]  ;;  %s137_s21 = smov 32   ;;  %vm44_vm0 = vcmask 261120   ;;  %v38_v1 = vld [vmem:[#allocation4] sm:$0xff] }
  0x1a   :  { %41 = vrot.lane.b32.xlu0 %v39_v0, %s137_s21  ;;  %s138_s1 = smov [#allocation9]   ;;  %vm47_vm1 = vcmask 523264  }
  0x1b   :  { %s55_s22 = sshll.u32 %s138_s1, 4  ;;  %s56_s22 = int_to_ptr.vmem [resolvable:$true] %s55_s22 }
  0x1c   :  { %s109_s23 = scalar_lea.vmem %s56_s22, 128  ;;  %p114_p11 = scmp.lt.s32.totalorder %s56_s22, %s56_s22 }
  0x1d   :  { %p110_p10 = scmp.ne.s32.totalorder %s56_s22, %s109_s23  ;;  %p115_p12 = scmp.lt.s32.totalorder %s109_s23, %s109_s23 }
  0x1f   :  { %p116_p13 = por %p115_p12, %p114_p11 }
  0x21   :  { %p117_p0 = pnand %p116_p13, %p110_p10 }
  0x8c   :  { %v42_v2 = vpop.permute.xlu0 %41 }
  0x8d   :  { %v45_v3 = vsel %vm44_vm0, %v39_v0, %v42_v2 }
  0x8e   :  { %v46_v4 = vadd.f32 %v45_v3, %v38_v1 }
  0x90   :  { %48 = vst.msk [vmem:[#allocation9] sm:$0xff] %vm47_vm1, %v46_v4 }
  0x91   :  { %120 = shalt.err (!%p117_p0)
}
  0x92   :  { %58 = dma.vmem_to_hbm [thread:$0]  %s56_s22, 128, %s171_s3, [#allocation6]  }
  0x93   :  { %133 = dma.done.wait [#allocation6], 128  }
  0x94   :  { %134 = vsyncadd [#allocation6], 4294967168 }
  0x95   :  { %62 = vsyncpa [#allocation5], 1 }
  0x96   :  { %63 = vsyncpa [#allocation8], 1 }
  0x97   :  { %64 = vsyncpa [#allocation6], 1 }

</bundles_post_ra>
